<compile_context>
chip_gen: v7x
topology: tpu7x:2x2x1
jax: 0.10.0
libtpu: 0.0.40
codegen_flags: <defaults>
</compile_context>

<pallas_src>
import jax
import jax.numpy as jnp
from jax.experimental import pallas as pl
from jax.experimental.pallas import tpu as pltpu

H1 = 64                 # ln1 output features
OUT = 224 * 224         # ln2 output features (50176)
TN = 12544              # output tile along the 50176 dim (50176 / 12544 = 4 steps)


def _silu(v):
    return v * jax.nn.sigmoid(v)


# ---------------------------------------------------------------------------
# Stage 1: SiLU -> Linear(7, 64) -> SiLU -> mean over the N detections.
# Single-block kernel; all operands fit in VMEM trivially (~0.01% of the FLOPs).
# ---------------------------------------------------------------------------
def track_embed_kernel(x_ref, w1_ref, b1_ref, m_ref):
    x = x_ref[...].astype(jnp.float32)
    xs = _silu(x)
    h = jnp.dot(xs, w1_ref[...].astype(jnp.float32),
                preferred_element_type=jnp.float32)
    h = _silu(h + b1_ref[...].astype(jnp.float32))
    m_ref[...] = jnp.mean(h, axis=0, keepdims=True)


# ---------------------------------------------------------------------------
# Stage 2: Linear(64, 224*224) -> SiLU -> clamp(0, 1), tiled along the 50176
# output features.  Purely HBM-bound on streaming W2; grid axis is parallel.
# ---------------------------------------------------------------------------
def track_proj_kernel(m_ref, w2_ref, b2_ref, o_ref):
    w2 = w2_ref[...].astype(jnp.float32)
    b2 = b2_ref[...].astype(jnp.float32)
    y = jnp.dot(m_ref[...], w2, preferred_element_type=jnp.float32) + b2
    y = _silu(y)
    o_ref[...] = jnp.clip(y, 0.0, 1.0).astype(o_ref.dtype)


def track_block_encoder(x, w1, b1, w2, b2):
    """x: (N, 7).  w1: (7, 64), b1: (1, 64), w2: (64, 50176), b2: (1, 50176).

    w2/b2 may be bfloat16 (recommended: halves HBM traffic) or float32.
    Returns Track_Conf_Map: (224, 224) float32.
    """
    n = x.shape[0]
    assert x.shape[1] == 7
    assert n >= 1  # mean over zero detections is undefined; guard upstream
    num_tiles = OUT // TN

    # ---- Stage 1: (1, 64) mean detection embedding -------------------------
    m = pl.pallas_call(
        track_embed_kernel,
        out_shape=jax.ShapeDtypeStruct((1, H1), jnp.float32),
    )(x, w1, b1)

    # ---- Stage 2: big projection, tiled along output features --------------
    w2_bytes = int(w2.size) * w2.dtype.itemsize
    b2_bytes = int(b2.size) * b2.dtype.itemsize
    cost = pl.CostEstimate(
        flops=2 * H1 * OUT,
        transcendentals=OUT,                       # one sigmoid per output
        bytes_accessed=w2_bytes + b2_bytes + OUT * 4 + H1 * 4,
    )

    out_flat = pl.pallas_call(
        track_proj_kernel,
        out_shape=jax.ShapeDtypeStruct((1, OUT), jnp.float32),
        grid_spec=pltpu.PrefetchScalarGridSpec(
            num_scalar_prefetch=0,
            grid=(num_tiles,),
            in_specs=[
                pl.BlockSpec((1, H1), lambda i: (0, 0)),     # m (full, tiny)
                pl.BlockSpec((H1, TN), lambda i: (0, i)),    # W2 tile
                pl.BlockSpec((1, TN), lambda i: (0, i)),     # b2 tile
            ],
            out_specs=pl.BlockSpec((1, TN), lambda i: (0, i)),  # out tile
        ),
        compiler_params=pltpu.CompilerParams(
            dimension_semantics=("parallel",)),               # megacore-friendly
        cost_estimate=cost,
    )(m, w2, b2)

    return out_flat.reshape(224, 224)


def _reference(x, w1, b1, w2, b2):
    xs = _silu(x.astype(jnp.float32))
    h = _silu(xs @ w1.astype(jnp.float32) + b1.astype(jnp.float32))
    m = jnp.mean(h, axis=0, keepdims=True)
    y = _silu(m @ w2.astype(jnp.float32) + b2.astype(jnp.float32))
    return jnp.clip(y, 0.0, 1.0).reshape(224, 224)


if __name__ == "__main__":
    key = jax.random.PRNGKey(0)
    k_x, k_w1, k_b1, k_w2, k_b2 = jax.random.split(key, 5)

    # Small detection list: N=8 rows of 7 features (time-diff, conf, class, box)
    N = 8
    x = jax.random.uniform(k_x, (N, 7), dtype=jnp.float32)

    # Deterministic synthetic parameters mimicking nn.Linear init bounds.
    bound1 = 1.0 / jnp.sqrt(7.0)
    w1 = jax.random.uniform(k_w1, (7, H1), jnp.float32, -bound1, bound1)
    b1 = jax.random.uniform(k_b1, (1, H1), jnp.float32, -bound1, bound1)
    bound2 = 1.0 / jnp.sqrt(float(H1))
    w2 = jax.random.uniform(k_w2, (H1, OUT), jnp.float32, -bound2, bound2)
    b2 = jax.random.uniform(k_b2, (1, OUT), jnp.float32, -bound2, bound2)

    # Store the large projection weights in bf16 to halve the HBM stream; the
    # kernel upcasts and accumulates in f32.  (Pass the f32 w2/b2 instead for
    # bit-faithful original numerics.)
    w2_q = w2.astype(jnp.bfloat16)
    b2_q = b2.astype(jnp.bfloat16)

    out = track_block_encoder(x, w1, b1, w2_q, b2_q)
    out = jax.block_until_ready(out)

    # Validate against a pure-JAX reference using the same (bf16-stored)
    # weights upcast to f32, i.e. exactly what the kernel computes.
    ref = _reference(x, w1, b1, w2_q, b2_q)
    assert out.shape == (224, 224)
    assert jnp.allclose(out, ref, atol=1e-5, rtol=1e-5)

    print("KERNEL_OK")
</pallas_src>

<mosaic_0001>
module attributes {stable_mosaic.version = 11 : i64} {
  func.func @track_embed_kernel(%arg0: memref<8x7xf32, #tpu.memory_space<vmem>>, %arg1: memref<7x64xf32, #tpu.memory_space<vmem>>, %arg2: memref<1x64xf32, #tpu.memory_space<vmem>>, %arg3: memref<1x64xf32, #tpu.memory_space<vmem>>) attributes {dimension_semantics = [], scalar_prefetch = 0 : i64, scratch_operands = 0 : i64, tpu.core_type = #tpu.core_type<tc>} {
    %c0 = arith.constant 0 : index
    %c0_0 = arith.constant 0 : index
    %0 = vector.load %arg0[%c0, %c0_0] : memref<8x7xf32, #tpu.memory_space<vmem>>, vector<8x7xf32>
    %1 = arith.negf %0 : vector<8x7xf32>
    %2 = math.exp %1 : vector<8x7xf32>
    %cst = arith.constant 1.000000e+00 : f32
    %3 = vector.broadcast %cst : f32 to vector<8x7xf32>
    %4 = arith.addf %3, %2 : vector<8x7xf32>
    %5 = arith.divf %3, %4 : vector<8x7xf32>
    %6 = arith.mulf %0, %5 : vector<8x7xf32>
    %c0_1 = arith.constant 0 : index
    %c0_2 = arith.constant 0 : index
    %7 = vector.load %arg1[%c0_1, %c0_2] : memref<7x64xf32, #tpu.memory_space<vmem>>, vector<7x64xf32>
    %cst_3 = arith.constant dense<0.000000e+00> : vector<8x64xf32>
    %8 = tpu.matmul %6, %7, %cst_3 {dimension_numbers = #tpu.dot_dimension_numbers<[1], [0], [0], [1], [0, 0, 1, 1], [], []>} : vector<8x7xf32>, vector<7x64xf32>, vector<8x64xf32> -> vector<8x64xf32>
    %c0_4 = arith.constant 0 : index
    %c0_5 = arith.constant 0 : index
    %9 = vector.load %arg2[%c0_4, %c0_5] : memref<1x64xf32, #tpu.memory_space<vmem>>, vector<1x64xf32>
    %10 = vector.broadcast %9 : vector<1x64xf32> to vector<8x64xf32>
    %11 = arith.addf %8, %10 : vector<8x64xf32>
    %12 = arith.negf %11 : vector<8x64xf32>
    %13 = math.exp %12 : vector<8x64xf32>
    %cst_6 = arith.constant 1.000000e+00 : f32
    %14 = vector.broadcast %cst_6 : f32 to vector<8x64xf32>
    %15 = arith.addf %14, %13 : vector<8x64xf32>
    %16 = arith.divf %14, %15 : vector<8x64xf32>
    %17 = arith.mulf %11, %16 : vector<8x64xf32>
    %cst_7 = arith.constant dense<0.000000e+00> : vector<64xf32>
    %18 = vector.multi_reduction <add>, %17, %cst_7 [0] : vector<8x64xf32> to vector<64xf32>
    %19 = vector.shape_cast %18 : vector<64xf32> to vector<1x64xf32>
    %cst_8 = arith.constant 8.000000e+00 : f32
    %20 = vector.broadcast %cst_8 : f32 to vector<1x64xf32>
    %21 = arith.divf %19, %20 : vector<1x64xf32>
    %c0_9 = arith.constant 0 : index
    %c0_10 = arith.constant 0 : index
    %22 = vector.load %arg3[%c0_9, %c0_10] : memref<1x64xf32, #tpu.memory_space<vmem>>, vector<1x64xf32>
    tpu.vector_store %arg3[%c0_9, %c0_10], %21 {strides = array<i32>} : memref<1x64xf32, #tpu.memory_space<vmem>>, vector<1x64xf32>,
    return
  }
}

</mosaic_0001>

<bundles_post_ra>
// kernel: tpu_custom_call.1
= control target key start
LH: loop header
LB: loop body
LE: loop exit
PB: predicated region body
PF: predicated region fallthrough
CT: control target
= control target key end

     0   :  { %8 = vsyncpa [#allocation3], 0  ;;  %s329_s0 = inlined_call_operand.hbm [shape: f32[8,7], index: 0, kind: input, shape index: {}]   ;;  %s330_s1 = inlined_call_operand.hbm [shape: f32[7,64], index: 1, kind: input, shape index: {}]   ;;  %s331_s2 = inlined_call_operand.vmem [shape: f32[1,64], index: 2, kind: input, shape index: {}]   ;;  %s332_s3 = inlined_call_operand.hbm [shape: f32[1,64], index: 3, kind: output, shape index: {}]  }
   0x1   :  { %9 = vsyncpa [#allocation6], 0 }
   0x2   :  { %10 = vsyncpa [#allocation4], 0  ;;  %s265_s12 = smov [#allocation2]   ;;  %s266_s14 = smov [#allocation5]  }
   0x3   :  { %s17_s13 = sshll.u32 %s265_s12, 4  ;;  %s27_s15 = sshll.u32 %s266_s14, 4  ;;  %s18_s13 = int_to_ptr.vmem [resolvable:$true] %s17_s13  ;;  %s28_s15 = int_to_ptr.vmem [resolvable:$true] %s27_s15 }
   0x4   :  { %s193_s18 = scalar_lea.hbm %s329_s0, 128 }
   0x5   :  { %p194_p0 = scmp.ne.s32.totalorder %s329_s0, %s193_s18  ;;  %p197_p1 = scmp.lt.u32.totalorder %s193_s18, %s329_s0 }
   0x7   :  { %p199_p2 = pnand %p197_p1, %p194_p0 }
   0x9   :  { %202 = shalt.err (!%p199_p2)
}
   0xa   :  { %s203_s23 = scalar_lea.vmem %s18_s13, 128  ;;  %p208_p4 = scmp.lt.s32.totalorder %s18_s13, %s18_s13 }
   0xb   :  { %p204_p3 = scmp.ne.s32.totalorder %s18_s13, %s203_s23  ;;  %p209_p5 = scmp.lt.s32.totalorder %s203_s23, %s203_s23 }
   0xd   :  { %p210_p6 = por %p209_p5, %p208_p4 }
   0xf   :  { %p211_p7 = pnand %p210_p6, %p204_p3 }
  0x11   :  { %214 = shalt.err (!%p211_p7)
}
  0x12   :  { %20 = dma.hbm_to_vmem [thread:$0]  %s329_s0, 128, %s18_s13, [#allocation3]  }
  0x13   :  { %s215_s28 = scalar_lea.hbm %s330_s1, 128 }
  0x14   :  { %p216_p8 = scmp.ne.s32.totalorder %s330_s1, %s215_s28  ;;  %p219_p9 = scmp.lt.u32.totalorder %s215_s28, %s330_s1 }
  0x16   :  { %p221_p10 = pnand %p219_p9, %p216_p8 }
  0x18   :  { %224 = shalt.err (!%p221_p10)
}
  0x19   :  { %s225_s6 = scalar_lea.vmem %s28_s15, 128  ;;  %p230_p12 = scmp.lt.s32.totalorder %s28_s15, %s28_s15 }
  0x1a   :  { %p226_p11 = scmp.ne.s32.totalorder %s28_s15, %s225_s6  ;;  %p231_p13 = scmp.lt.s32.totalorder %s225_s6, %s225_s6 }
  0x1c   :  { %p232_p0 = por %p231_p13, %p230_p12 }
  0x1e   :  { %p233_p1 = pnand %p232_p0, %p226_p11 }
  0x20   :  { %236 = shalt.err (!%p233_p1)
}
  0x21   :  { %30 = dma.hbm_to_vmem [thread:$0]  %s330_s1, 128, %s28_s15, [#allocation6]  }
  0x22   :  { %259 = dma.done.wait [#allocation3], 128  }
  0x23   :  { %260 = vsyncadd [#allocation3], 4294967168 }
  0x24   :  { %261 = dma.done.wait [#allocation6], 128  }
  0x25   :  { %262 = vsyncadd [#allocation6], 4294967168  ;;  %v267_v0 = vmov 0.0   ;;  %vm268_vm0 = vmmov 0   ;;  %vm59_vm1 = vcmask 1046528   ;;  %v39_v2 = vld [vmem:[#allocation2] sm:$0xff] }
  0x26   :  { %175 = vmatprep.subr.mxu0 %v267_v0  ;;  %177 = vmatprep.mubr.msk.f32.mxu0 %vm268_vm0, %v267_v0  ;;  %v47_v1 = vld [vmem:[#allocation5] sm:$0x7f]  ;;  %v168_v3 = vmul.f32 -1.442695, %v39_v2  ;;  %vm55_vm2 = vcmask 56320   ;;  %vm140_vm3 = vcmask 523264  }
  0x27   :  { %176 = vmatpush3.msk.msra.mxu0 %vm59_vm1, %v47_v1  ;;  %v169_v8 = vld [vmem:[%s331_s2] ss:$0 sm:$0xff]  ;;  %s269_s9 = smov [#allocation7]   ;;  %vm150_vm4 = vcmask 516096  }
  0x28   :  { %185 = vpow2.f32 %v168_v3  ;;  %s158_s10 = sshll.u32 %s269_s9, 4  ;;  %s159_s10 = int_to_ptr.vmem [resolvable:$true] %s158_s10 }
  0x29   :  { %s237_s2 = scalar_lea.vmem %s159_s10, 16  ;;  %s241_s11 = scalar_lea.vmem %s159_s10, 32 }
  0x2a   :  { %p238_p2 = scmp.ne.s32.totalorder %s159_s10, %s237_s2  ;;  %p242_p3 = scmp.lt.s32.totalorder %s159_s10, %s159_s10 }
  0x2b   :  { %p243_p4 = scmp.lt.s32.totalorder %s241_s11, %s237_s2 }
  0x2d   :  { %p244_p5 = por %p243_p4, %p242_p3 }
  0x2f   :  { %p245_p6 = pnand %p244_p5, %p238_p2 }
  0x32   :  { %v186_v4 = vpop.eup %185 }
  0x33   :  { %v43_v5 = vadd.f32 1.0, %v186_v4 }
  0x35   :  { %187 = vrcp.f32 %v43_v5 }
  0x3f   :  { %v188_v6 = vpop.eup %187 }
  0x40   :  { %v46_v7 = vmul.f32 %v188_v6, %v39_v2 }
  0x42   :  { %178 = vmatmul.mubr.msk.f32.vlgmr.msra.gmra.mrb[0].mxu0 %vm55_vm2, %v46_v7 }
 0x115   :  { %v129_v9 = vpop.f32.mrb[0].mxu0 }
 0x116   :  { %v130_v10 = vadd.f32 %v169_v8, %v129_v9  ;;  %v179_v11 = vpop.f32.mrb[1].mxu0 }
 0x118   :  { %v172_v12 = vmul.f32 -1.442695, %v130_v10 }
 0x11a   :  { %189 = vpow2.f32 %v172_v12 }
 0x124   :  { %v190_v13 = vpop.eup %189 }
 0x125   :  { %v136_v14 = vadd.f32 1.0, %v190_v13 }
 0x127   :  { %191 = vrcp.f32 %v136_v14 }
 0x131   :  { %v192_v15 = vpop.eup %191 }
 0x132   :  { %v139_v16 = vmul.f32 %v192_v15, %v130_v10 }
 0x134   :  { %v141_v17 = vsel %vm140_vm3, %v139_v16, 0.0 }
 0x135   :  { %v142_v18 = vrot.slane %v141_v17, 4 }
 0x137   :  { %v143_v19 = vadd.f32 %v142_v18, %v141_v17 }
 0x139   :  { %v144_v20 = vrot.slane %v143_v19, 2 }
 0x13b   :  { %v145_v21 = vadd.f32 %v144_v20, %v143_v19 }
 0x13d   :  { %v146_v22 = vrot.slane %v145_v21, 1 }
 0x13f   :  { %v147_v23 = vadd.f32 %v146_v22, %v145_v21 }
 0x141   :  { %v149_v24 = vmul.f32 0.125, %v147_v23 }
 0x143   :  { %151 = vst.msk [vmem:[#allocation7] sm:$0x1] %vm150_vm4, %v149_v24 }
 0x144   :  { %248 = shalt.err (!%p245_p6)
}
 0x145   :  { %s249_s14 = scalar_lea.hbm %s332_s3, 16 }
 0x146   :  { %p250_p7 = scmp.ne.s32.totalorder %s332_s3, %s249_s14  ;;  %p253_p8 = scmp.lt.u32.totalorder %s249_s14, %s332_s3 }
 0x148   :  { %p255_p9 = pnand %p253_p8, %p250_p7 }
 0x14a   :  { %258 = shalt.err (!%p255_p9)
}
 0x14b   :  { %161 = dma.vmem_to_hbm [thread:$0]  %s159_s10, 16, %s332_s3, [#allocation4]  }
 0x14c   :  { %263 = dma.done.wait [#allocation4], 16  }
 0x14d   :  { %264 = vsyncadd [#allocation4], 4294967280 }
 0x14e   :  { %165 = vsyncpa [#allocation3], 1 }
 0x14f   :  { %166 = vsyncpa [#allocation6], 1 }
 0x150   :  { %167 = vsyncpa [#allocation4], 1 }

</bundles_post_ra>
